<compile_context>
chip_gen: v5e
topology: v5e:2x2
jax: 0.10.0
libtpu: 0.0.40
codegen_flags: <defaults>
</compile_context>

<pallas_src>
import jax
import jax.numpy as jnp
from jax.experimental import pallas as pl
from jax.experimental.pallas import tpu as pltpu

IN_FEATURES = 28 * 28      # 784
HID = 50                   # true hidden width
OUT = 10                   # true number of classes
HPAD = 128                 # padded (lane-dense) feature width


def mlp_kernel(x_ref, w1_ref, b1_ref, w2_ref, b2_ref, w3_ref, b3_ref, o_ref):
    # Whole forward pass fused; weights stay resident in VMEM across grid steps.
    x = x_ref[...]                                                   # bf16 [TB, 784]

    # fc1 + ReLU   (dropout = identity in eval mode)
    h1 = jnp.dot(x, w1_ref[...], preferred_element_type=jnp.float32) + b1_ref[...]
    h1 = jnp.maximum(h1, 0.0)                                        # f32 [TB, 128]

    # fc2 + ReLU   (dropout = identity in eval mode)
    h2 = jnp.dot(h1.astype(jnp.bfloat16), w2_ref[...],
                 preferred_element_type=jnp.float32) + b2_ref[...]
    h2 = jnp.maximum(h2, 0.0)                                        # f32 [TB, 128]

    # fc3 — padded class columns (>=10) carry bias -1e30, so they vanish in
    # the softmax sum and don't perturb the real log-probs.
    logits = jnp.dot(h2.astype(jnp.bfloat16), w3_ref[...],
                     preferred_element_type=jnp.float32) + b3_ref[...]   # [TB, 128]

    # log_softmax over dim=1 (numerically stable)
    m = jnp.max(logits, axis=-1, keepdims=True)
    shifted = logits - m
    lse = jnp.log(jnp.sum(jnp.exp(shifted), axis=-1, keepdims=True))
    o_ref[...] = (shifted - lse).astype(o_ref.dtype)


def _round_up(n, m):
    return (n + m - 1) // m * m


def _pad_to(a, shape):
    return jnp.pad(a, [(0, t - s) for s, t in zip(a.shape, shape)])


def net_forward(x, params, *, max_tb=512):
    """x: [B, 1, 28, 28] or [B, 784] float32. Returns log-probs [B, 10]."""
    w1, b1, w2, b2, w3, b3 = params
    x2d = x.reshape(-1, IN_FEATURES).astype(jnp.float32)             # x.view(-1, 784)
    B = x2d.shape[0]

    # --- pack parameters: pad feature dims to 128, cast matmul weights to bf16.
    w1p = _pad_to(w1, (IN_FEATURES, HPAD)).astype(jnp.bfloat16)
    b1p = _pad_to(b1.reshape(1, -1), (1, HPAD)).astype(jnp.float32)
    w2p = _pad_to(w2, (HPAD, HPAD)).astype(jnp.bfloat16)
    b2p = _pad_to(b2.reshape(1, -1), (1, HPAD)).astype(jnp.float32)
    w3p = _pad_to(w3, (HPAD, HPAD)).astype(jnp.bfloat16)
    # padded class columns get a huge negative bias so log_softmax ignores them
    b3p = jnp.concatenate(
        [b3.reshape(1, -1).astype(jnp.float32),
         jnp.full((1, HPAD - OUT), -1e30, jnp.float32)], axis=1)

    # --- batch tiling: TB rows per grid step (multiple of 8, capped at max_tb).
    TB = min(max_tb, _round_up(B, 8))
    Bp = _round_up(B, TB)
    xp = _pad_to(x2d, (Bp, IN_FEATURES)).astype(jnp.bfloat16)
    grid = (Bp // TB,)

    flops = 2 * Bp * (IN_FEATURES * HPAD + HPAD * HPAD + HPAD * HPAD)
    bytes_accessed = (Bp * IN_FEATURES * 2                      # x (bf16)
                      + (IN_FEATURES * HPAD + 2 * HPAD * HPAD) * 2   # weights (bf16)
                      + 3 * HPAD * 4                            # biases (f32)
                      + Bp * HPAD * 4)                          # output (f32)

    resident = lambda shape: pl.BlockSpec(shape, lambda i: (0, 0))

    out = pl.pallas_call(
        mlp_kernel,
        out_shape=jax.ShapeDtypeStruct((Bp, HPAD), jnp.float32),
        grid=grid,
        in_specs=[
            pl.BlockSpec((TB, IN_FEATURES), lambda i: (i, 0)),   # x tile streams
            resident((IN_FEATURES, HPAD)), resident((1, HPAD)),  # fc1
            resident((HPAD, HPAD)),        resident((1, HPAD)),  # fc2
            resident((HPAD, HPAD)),        resident((1, HPAD)),  # fc3
        ],
        out_specs=pl.BlockSpec((TB, HPAD), lambda i: (i, 0)),
        compiler_params=pltpu.CompilerParams(
            dimension_semantics=("parallel",)),
        cost_estimate=pl.CostEstimate(
            flops=flops,
            transcendentals=Bp * (HPAD + 1),
            bytes_accessed=bytes_accessed),
    )(xp, w1p, b1p, w2p, b2p, w3p, b3p)

    return out[:B, :OUT]


def init_params(key):
    """Deterministic init mimicking torch.nn.Linear's uniform(-1/sqrt(fan_in), +)."""
    def linear(key, fan_in, fan_out):
        kw, kb = jax.random.split(key)
        bound = 1.0 / jnp.sqrt(float(fan_in))
        w = jax.random.uniform(kw, (fan_in, fan_out), jnp.float32, -bound, bound)
        b = jax.random.uniform(kb, (1, fan_out), jnp.float32, -bound, bound)
        return w, b

    k1, k2, k3 = jax.random.split(key, 3)
    w1, b1 = linear(k1, IN_FEATURES, HID)
    w2, b2 = linear(k2, HID, HID)
    w3, b3 = linear(k3, HID, OUT)
    return (w1, b1, w2, b2, w3, b3)


def reference_forward(x, params):
    """Pure-JAX f32 reference (dropout = identity in eval mode)."""
    w1, b1, w2, b2, w3, b3 = params
    h = x.reshape(-1, IN_FEATURES).astype(jnp.float32)
    h = jnp.maximum(h @ w1 + b1, 0.0)
    h = jnp.maximum(h @ w2 + b2, 0.0)
    logits = h @ w3 + b3
    return jax.nn.log_softmax(logits, axis=-1)


if __name__ == "__main__":
    key = jax.random.PRNGKey(0)
    kx, kp = jax.random.split(key)

    # Small MNIST-like batch: [B, C, H, W] = [8, 1, 28, 28]
    x = jax.random.normal(kx, (8, 1, 28, 28), jnp.float32)
    params = init_params(kp)

    out = net_forward(x, params)
    out = jax.block_until_ready(out)

    # Sanity: shape, log-softmax rows sum to 1 in prob space, matches f32 ref
    # within bf16 matmul tolerance.
    assert out.shape == (8, 10)
    row_sums = jnp.exp(out).sum(axis=1)
    assert bool(jnp.all(jnp.abs(row_sums - 1.0) < 1e-3))
    ref = reference_forward(x, params)
    assert bool(jnp.all(jnp.abs(out - ref) < 0.1))

    print("KERNEL_OK")
</pallas_src>

<mosaic_0001>
module attributes {stable_mosaic.version = 11 : i64} {
  func.func @mlp_kernel(%arg0: i32, %arg1: memref<8x784xbf16, #tpu.memory_space<vmem>>, %arg2: memref<784x128xbf16, #tpu.memory_space<vmem>>, %arg3: memref<1x128xf32, #tpu.memory_space<vmem>>, %arg4: memref<128x128xbf16, #tpu.memory_space<vmem>>, %arg5: memref<1x128xf32, #tpu.memory_space<vmem>>, %arg6: memref<128x128xbf16, #tpu.memory_space<vmem>>, %arg7: memref<1x128xf32, #tpu.memory_space<vmem>>, %arg8: memref<8x128xf32, #tpu.memory_space<vmem>>) attributes {dimension_semantics = [#tpu.dimension_semantics<parallel>], iteration_bounds = array<i64: 1>, scalar_prefetch = 0 : i64, scratch_operands = 0 : i64, tpu.core_type = #tpu.core_type<tc>, window_params = [{transform_indices = @transform_0, window_bounds = array<i64: 8, 784>}, {pipeline_mode = #tpu.pipeline_mode<synchronous>, transform_indices = @transform_1, window_bounds = array<i64: 784, 128>}, {pipeline_mode = #tpu.pipeline_mode<synchronous>, transform_indices = @transform_2, window_bounds = array<i64: 1, 128>}, {pipeline_mode = #tpu.pipeline_mode<synchronous>, transform_indices = @transform_3, window_bounds = array<i64: 128, 128>}, {pipeline_mode = #tpu.pipeline_mode<synchronous>, transform_indices = @transform_4, window_bounds = array<i64: 1, 128>}, {pipeline_mode = #tpu.pipeline_mode<synchronous>, transform_indices = @transform_5, window_bounds = array<i64: 128, 128>}, {pipeline_mode = #tpu.pipeline_mode<synchronous>, transform_indices = @transform_6, window_bounds = array<i64: 1, 128>}, {transform_indices = @transform_7, window_bounds = array<i64: 8, 128>}]} {
    %c0 = arith.constant 0 : index
    %c0_0 = arith.constant 0 : index
    %0 = vector.load %arg1[%c0, %c0_0] : memref<8x784xbf16, #tpu.memory_space<vmem>>, vector<8x784xbf16>
    %c0_1 = arith.constant 0 : index
    %c0_2 = arith.constant 0 : index
    %1 = vector.load %arg2[%c0_1, %c0_2] : memref<784x128xbf16, #tpu.memory_space<vmem>>, vector<784x128xbf16>
    %cst = arith.constant dense<0.000000e+00> : vector<8x128xf32>
    %2 = tpu.matmul %0, %1, %cst {dimension_numbers = #tpu.dot_dimension_numbers<[1], [0], [0], [1], [0, 0, 1, 1], [], []>} : vector<8x784xbf16>, vector<784x128xbf16>, vector<8x128xf32> -> vector<8x128xf32>
    %c0_3 = arith.constant 0 : index
    %c0_4 = arith.constant 0 : index
    %3 = vector.load %arg3[%c0_3, %c0_4] : memref<1x128xf32, #tpu.memory_space<vmem>>, vector<1x128xf32>
    %4 = vector.broadcast %3 : vector<1x128xf32> to vector<8x128xf32>
    %5 = arith.addf %2, %4 : vector<8x128xf32>
    %cst_5 = arith.constant 0.000000e+00 : f32
    %6 = vector.broadcast %cst_5 : f32 to vector<8x128xf32>
    %7 = arith.maximumf %5, %6 : vector<8x128xf32>
    %8 = arith.truncf %7 : vector<8x128xf32> to vector<8x128xbf16>
    %c0_6 = arith.constant 0 : index
    %c0_7 = arith.constant 0 : index
    %9 = vector.load %arg4[%c0_6, %c0_7] : memref<128x128xbf16, #tpu.memory_space<vmem>>, vector<128x128xbf16>
    %cst_8 = arith.constant dense<0.000000e+00> : vector<8x128xf32>
    %10 = tpu.matmul %8, %9, %cst_8 {dimension_numbers = #tpu.dot_dimension_numbers<[1], [0], [0], [1], [0, 0, 1, 1], [], []>} : vector<8x128xbf16>, vector<128x128xbf16>, vector<8x128xf32> -> vector<8x128xf32>
    %c0_9 = arith.constant 0 : index
    %c0_10 = arith.constant 0 : index
    %11 = vector.load %arg5[%c0_9, %c0_10] : memref<1x128xf32, #tpu.memory_space<vmem>>, vector<1x128xf32>
    %12 = vector.broadcast %11 : vector<1x128xf32> to vector<8x128xf32>
    %13 = arith.addf %10, %12 : vector<8x128xf32>
    %cst_11 = arith.constant 0.000000e+00 : f32
    %14 = vector.broadcast %cst_11 : f32 to vector<8x128xf32>
    %15 = arith.maximumf %13, %14 : vector<8x128xf32>
    %16 = arith.truncf %15 : vector<8x128xf32> to vector<8x128xbf16>
    %c0_12 = arith.constant 0 : index
    %c0_13 = arith.constant 0 : index
    %17 = vector.load %arg6[%c0_12, %c0_13] : memref<128x128xbf16, #tpu.memory_space<vmem>>, vector<128x128xbf16>
    %cst_14 = arith.constant dense<0.000000e+00> : vector<8x128xf32>
    %18 = tpu.matmul %16, %17, %cst_14 {dimension_numbers = #tpu.dot_dimension_numbers<[1], [0], [0], [1], [0, 0, 1, 1], [], []>} : vector<8x128xbf16>, vector<128x128xbf16>, vector<8x128xf32> -> vector<8x128xf32>
    %c0_15 = arith.constant 0 : index
    %c0_16 = arith.constant 0 : index
    %19 = vector.load %arg7[%c0_15, %c0_16] : memref<1x128xf32, #tpu.memory_space<vmem>>, vector<1x128xf32>
    %20 = vector.broadcast %19 : vector<1x128xf32> to vector<8x128xf32>
    %21 = arith.addf %18, %20 : vector<8x128xf32>
    %cst_17 = arith.constant dense<0xFF800000> : vector<8xf32>
    %22 = vector.multi_reduction <maximumf>, %21, %cst_17 [1] : vector<8x128xf32> to vector<8xf32>
    %23 = vector.shape_cast %22 : vector<8xf32> to vector<8x1xf32>
    %24 = vector.broadcast %23 : vector<8x1xf32> to vector<8x128xf32>
    %25 = arith.subf %21, %24 : vector<8x128xf32>
    %26 = math.exp %25 : vector<8x128xf32>
    %cst_18 = arith.constant dense<0.000000e+00> : vector<8xf32>
    %27 = vector.multi_reduction <add>, %26, %cst_18 [1] : vector<8x128xf32> to vector<8xf32>
    %28 = vector.shape_cast %27 : vector<8xf32> to vector<8x1xf32>
    %29 = math.log %28 : vector<8x1xf32>
    %30 = vector.broadcast %29 : vector<8x1xf32> to vector<8x128xf32>
    %31 = arith.subf %25, %30 : vector<8x128xf32>
    %c0_19 = arith.constant 0 : index
    %c0_20 = arith.constant 0 : index
    %32 = vector.load %arg8[%c0_19, %c0_20] : memref<8x128xf32, #tpu.memory_space<vmem>>, vector<8x128xf32>
    tpu.vector_store %arg8[%c0_19, %c0_20], %31 {strides = array<i32>} : memref<8x128xf32, #tpu.memory_space<vmem>>, vector<8x128xf32>,
    return
  }
  func.func @transform_0(%arg0: i32) -> (i32, i32) {
    %c0_i32 = arith.constant 0 : i32
    %c0_i32_0 = arith.constant 0 : i32
    return %arg0, %c0_i32 : i32, i32
  }
  func.func @transform_1(%arg0: i32) -> (i32, i32) {
    %c0_i32 = arith.constant 0 : i32
    %c0_i32_0 = arith.constant 0 : i32
    %c0_i32_1 = arith.constant 0 : i32
    return %c0_i32, %c0_i32_0 : i32, i32
  }
  func.func @transform_2(%arg0: i32) -> (i32, i32) {
    %c0_i32 = arith.constant 0 : i32
    %c0_i32_0 = arith.constant 0 : i32
    %c0_i32_1 = arith.constant 0 : i32
    return %c0_i32, %c0_i32_0 : i32, i32
  }
  func.func @transform_3(%arg0: i32) -> (i32, i32) {
    %c0_i32 = arith.constant 0 : i32
    %c0_i32_0 = arith.constant 0 : i32
    %c0_i32_1 = arith.constant 0 : i32
    return %c0_i32, %c0_i32_0 : i32, i32
  }
  func.func @transform_4(%arg0: i32) -> (i32, i32) {
    %c0_i32 = arith.constant 0 : i32
    %c0_i32_0 = arith.constant 0 : i32
    %c0_i32_1 = arith.constant 0 : i32
    return %c0_i32, %c0_i32_0 : i32, i32
  }
  func.func @transform_5(%arg0: i32) -> (i32, i32) {
    %c0_i32 = arith.constant 0 : i32
    %c0_i32_0 = arith.constant 0 : i32
    %c0_i32_1 = arith.constant 0 : i32
    return %c0_i32, %c0_i32_0 : i32, i32
  }
  func.func @transform_6(%arg0: i32) -> (i32, i32) {
    %c0_i32 = arith.constant 0 : i32
    %c0_i32_0 = arith.constant 0 : i32
    %c0_i32_1 = arith.constant 0 : i32
    return %c0_i32, %c0_i32_0 : i32, i32
  }
  func.func @transform_7(%arg0: i32) -> (i32, i32) {
    %c0_i32 = arith.constant 0 : i32
    %c0_i32_0 = arith.constant 0 : i32
    return %arg0, %c0_i32 : i32, i32
  }
}

</mosaic_0001>

<bundles_post_ra>
// kernel: tpu_custom_call.1
= control target key start
LH: loop header
LB: loop body
LE: loop exit
PB: predicated region body
PF: predicated region fallthrough
CT: control target
= control target key end

     0   :  { %12 = vsyncpa [#allocation3], 0  ;;  %s1343_s0 = inlined_call_operand.hbm [shape: bf16[8,784], index: 0, kind: input, shape index: {}]   ;;  %s1344_s1 = inlined_call_operand.hbm [shape: bf16[784,128], index: 1, kind: input, shape index: {}]   ;;  %s1345_s2 = inlined_call_operand.vmem [shape: f32[1,128], index: 2, kind: input, shape index: {}]   ;;  %s1346_s3 = inlined_call_operand.hbm [shape: bf16[128,128], index: 3, kind: input, shape index: {}]   ;;  %s1347_s4 = inlined_call_operand.vmem [shape: f32[1,128], index: 4, kind: input, shape index: {}]   ;;  %s1348_s5 = inlined_call_operand.hbm [shape: bf16[128,128], index: 5, kind: input, shape index: {}]   ;;  %s1349_s6 = inlined_call_operand.vmem [shape: f32[1,128], index: 6, kind: input, shape index: {}]   ;;  %s1350_s7 = inlined_call_operand.hbm [shape: f32[8,128], index: 7, kind: output, shape index: {}]  }
   0x1   :  { %13 = vsyncpa [#allocation6], 0 }
   0x2   :  { %14 = vsyncpa [#allocation9], 0  ;;  %s31_s26 = sshll.u32 %s1344_s1, 4  ;;  %s32_s26 = int_to_ptr.hbm [resolvable:$true] %s31_s26 }
   0x3   :  { %15 = vsyncpa [#allocation4], 0  ;;  %s1272_s27 = smov [#allocation5]   ;;  %s21_s8 = sshll.u32 %s1343_s0, 4  ;;  %s22_s8 = int_to_ptr.hbm [resolvable:$true] %s21_s8 }
   0x4   :  { %s33_s28 = sshll.u32 %s1272_s27, 4  ;;  %s1273_s9 = smov 64   ;;  %s34_s28 = int_to_ptr.vmem [resolvable:$true] %s33_s28 }
   0x5   :  { %s1274_s10 = smov 4   ;;  %s1275_s11 = smov [#allocation2]  }
   0x6   :  { %39 = dma.hbm_to_vmem [thread:$0]  %s32_s26, 6272, %s34_s28, [#allocation6], %s1273_s9, %s1273_s9, %s1274_s10  }
   0x7   :  { %s23_s12 = sshll.u32 %s1275_s11, 4  ;;  %s46_s15 = sshll.u32 %s1346_s3, 4  ;;  %s24_s12 = int_to_ptr.vmem [resolvable:$true] %s23_s12  ;;  %s47_s15 = int_to_ptr.hbm [resolvable:$true] %s46_s15 }
   0x8   :  { %26 = dma.hbm_to_vmem [thread:$0]  %s22_s8, 448, %s24_s12, [#allocation3]  }
   0x9   :  { %s61_s17 = sshll.u32 %s1348_s5, 4  ;;  %s1276_s18 = smov [#allocation7]   ;;  %s62_s17 = int_to_ptr.hbm [resolvable:$true] %s61_s17 }
   0xa   :  { %s48_s19 = sshll.u32 %s1276_s18, 4  ;;  %s1277_s0 = smov [#allocation8]   ;;  %s49_s19 = int_to_ptr.vmem [resolvable:$true] %s48_s19 }
   0xb   :  { %54 = dma.hbm_to_vmem [thread:$0]  %s47_s15, 1024, %s49_s19, [#allocation6], %s1273_s9, %s1273_s9, %s1274_s10  }
   0xc   :  { %s63_s20 = sshll.u32 %s1277_s0, 4  ;;  %s64_s20 = int_to_ptr.vmem [resolvable:$true] %s63_s20 }
   0xd   :  { %69 = dma.hbm_to_vmem [thread:$0]  %s62_s17, 1024, %s64_s20, [#allocation9], %s1273_s9, %s1273_s9, %s1274_s10  }
   0xe   :  { %1264 = dma.done.wait [#allocation3], 448  }
   0xf   :  { %1265 = vsyncadd [#allocation3], 4294966848 }
  0x10   :  { %1266 = dma.done.wait [#allocation6], 7296  }
  0x11   :  { %1267 = vsyncadd [#allocation6], 4294960000 }
  0x12   :  { %1268 = dma.done.wait [#allocation9], 1024  }
  0x13   :  { %1269 = vsyncadd [#allocation9], 4294966272  ;;  %v1072_v0 = vld [vmem:[#allocation5 + $0x38] sm:$0xff]  ;;  %v1071_v3 = vld [vmem:[#allocation5 + $0x30] sm:$0xff]  ;;  %vm513_vm0 = vcmask 130048   ;;  %s792_s27 = sshll.u32 %s1350_s7, 4  ;;  %s793_s27 = int_to_ptr.hbm [resolvable:$true] %s792_s27 }
  0x14   :  { %v1080_v1 = vld [vmem:[#allocation5 + $0x78] sm:$0xff]  ;;  %517 = vmatpush.bf16.msra.mxu0 %v1072_v0  ;;  %v1079_v4 = vld [vmem:[#allocation5 + $0x70] sm:$0xff]  ;;  %v1070_v8 = vld [vmem:[#allocation5 + $0x28] sm:$0xff] }
  0x15   :  { %v1088_v2 = vld [vmem:[#allocation5 + $0xb8] sm:$0xff]  ;;  %530 = vmatpush.bf16.msra.mxu1 %v1080_v1  ;;  %v1087_v5 = vld [vmem:[#allocation5 + $0xb0] sm:$0xff]  ;;  %v1078_v9 = vld [vmem:[#allocation5 + $0x68] sm:$0xff] }
  0x16   :  { %543 = vmatpush.bf16.msra.mxu2 %v1088_v2  ;;  %v1096_v6 = vld [vmem:[#allocation5 + $0xf8] sm:$0xff]  ;;  %v1095_v7 = vld [vmem:[#allocation5 + $0xf0] sm:$0xff]  ;;  %v1086_v10 = vld [vmem:[#allocation5 + $0xa8] sm:$0xff] }
  0x17   :  { %556 = vmatpush.bf16.msra.mxu3 %v1096_v6  ;;  %v1094_v11 = vld [vmem:[#allocation5 + $0xe8] sm:$0xff]  ;;  %v1069_v12 = vld [vmem:[#allocation5 + $0x20] sm:$0xff]  ;;  %v1068_v16 = vld [vmem:[#allocation5 + $0x18] sm:$0xff] }
  0x18   :  { %518 = vmatpush.bf16.msra.mxu0 %v1071_v3  ;;  %v1077_v13 = vld [vmem:[#allocation5 + $0x60] sm:$0xff]  ;;  %v1076_v17 = vld [vmem:[#allocation5 + $0x58] sm:$0xff]  ;;  %v1067_v20 = vld [vmem:[#allocation5 + $0x10] sm:$0xff] }
  0x19   :  { %531 = vmatpush.bf16.msra.mxu1 %v1079_v4  ;;  %v1085_v14 = vld [vmem:[#allocation5 + $0xa0] sm:$0xff]  ;;  %v1084_v18 = vld [vmem:[#allocation5 + $0x98] sm:$0xff]  ;;  %v1075_v21 = vld [vmem:[#allocation5 + $0x50] sm:$0xff] }
  0x1a   :  { %544 = vmatpush.bf16.msra.mxu2 %v1087_v5  ;;  %v1093_v15 = vld [vmem:[#allocation5 + $0xe0] sm:$0xff]  ;;  %v1092_v19 = vld [vmem:[#allocation5 + $0xd8] sm:$0xff]  ;;  %v1083_v22 = vld [vmem:[#allocation5 + $0x90] sm:$0xff] }
  0x1b   :  { %557 = vmatpush.bf16.msra.mxu3 %v1095_v7  ;;  %v1091_v23 = vld [vmem:[#allocation5 + $0xd0] sm:$0xff]  ;;  %v1066_v24 = vld [vmem:[#allocation5 + $0x8] sm:$0xff]  ;;  %v1065_v32 = vld [vmem:[#allocation5] sm:$0xff] }
  0x1c   :  { %519 = vmatpush.bf16.msra.mxu0 %v1070_v8  ;;  %v1074_v25 = vld [vmem:[#allocation5 + $0x48] sm:$0xff]  ;;  %v1073_v33 = vld [vmem:[#allocation5 + $0x40] sm:$0xff]  ;;  %v1104_v34 = vld [vmem:[#allocation5 + $0x138] sm:$0xff] }
  0x1d   :  { %532 = vmatpush.bf16.msra.mxu1 %v1078_v9  ;;  %v89_v26 = vld [vmem:[#allocation2] sm:$0xff]  ;;  %v90_v28 = vld [vmem:[#allocation2 + $0x8] sm:$0xff]  ;;  %v1112_v35 = vld [vmem:[#allocation5 + $0x178] sm:$0xff] }
  0x1e   :  { %545 = vmatpush.bf16.msra.mxu2 %v1086_v10  ;;  %v1082_v27 = vld [vmem:[#allocation5 + $0x88] sm:$0xff]  ;;  %v199_v29 = vunpack.c.l.b16 %v89_v26  ;;  %v200_v31 = vunpack.c.h.b16 %v89_v26  ;;  %v1081_v36 = vld [vmem:[#allocation5 + $0x80] sm:$0xff]  ;;  %v201_v37 = vunpack.c.l.b16 %v90_v28  ;;  %v202_v40 = vunpack.c.h.b16 %v90_v28  ;;  %v1103_v43 = vld [vmem:[#allocation5 + $0x130] sm:$0xff] }
  0x1f   :  { %558 = vmatpush.bf16.msra.mxu3 %v1094_v11  ;;  %v1090_v30 = vld [vmem:[#allocation5 + $0xc8] sm:$0xff]  ;;  %v1089_v41 = vld [vmem:[#allocation5 + $0xc0] sm:$0xff]  ;;  %v1111_v44 = vld [vmem:[#allocation5 + $0x170] sm:$0xff] }
  0x20   :  { %520 = vmatpush.bf16.msra.mxu0 %v1069_v12  ;;  %v206_v38 = vpack.c.b16 %v199_v29, %v199_v29  ;;  %v207_v39 = vpack.c.b16 %v200_v31, %v200_v31  ;;  %v1113_v42 = vld [vmem:[#allocation5 + $0x180] sm:$0xff]  ;;  %v208_v45 = vpack.c.b16 %v201_v37, %v201_v37  ;;  %v209_v46 = vpack.c.b16 %v202_v40, %v202_v40  ;;  %v1102_v47 = vld [vmem:[#allocation5 + $0x128] sm:$0xff]  ;;  %v92_v51 = vld [vmem:[#allocation2 + $0x18] sm:$0xf] }
  0x21   :  { %533 = vmatpush.bf16.msra.mxu1 %v1077_v13  ;;  %v1110_v48 = vld [vmem:[#allocation5 + $0x168] sm:$0xff]  ;;  %v1101_v49 = vld [vmem:[#allocation5 + $0x120] sm:$0xff]  ;;  %v1100_v52 = vld [vmem:[#allocation5 + $0x118] sm:$0xff]  ;;  %v205_v54 = vunpack.c.l.b16 %v92_v51 }
  0x22   :  { %546 = vmatpush.bf16.msra.mxu2 %v1085_v14  ;;  %v1109_v50 = vld [vmem:[#allocation5 + $0x160] sm:$0xff]  ;;  %v1108_v53 = vld [vmem:[#allocation5 + $0x158] sm:$0xff]  ;;  %v1099_v55 = vld [vmem:[#allocation5 + $0x110] sm:$0xff] }
  0x23   :  { %559 = vmatpush.bf16.msra.mxu3 %v1093_v15  ;;  %v1107_v56 = vld [vmem:[#allocation5 + $0x150] sm:$0xff]  ;;  %v212_v57 = vpack.c.b16 %v205_v54, %v205_v54  ;;  %v1098_v58 = vld [vmem:[#allocation5 + $0x108] sm:$0xff]  ;;  %v1097_v63 = vld [vmem:[#allocation5 + $0x100] sm:$0xff] }
  0x24   :  { %521 = vmatpush.bf16.msra.mxu0 %v1068_v16  ;;  %v1106_v59 = vld [vmem:[#allocation5 + $0x148] sm:$0xff]  ;;  %v91_v60 = vld [vmem:[#allocation2 + $0x10] sm:$0xff]  ;;  %v1105_v0 = vld [vmem:[#allocation5 + $0x140] sm:$0xff] }
  0x25   :  { %534 = vmatpush.bf16.msra.mxu1 %v1076_v17  ;;  %v203_v61 = vunpack.c.l.b16 %v91_v60  ;;  %v204_v62 = vunpack.c.h.b16 %v91_v60  ;;  %v1121_v3 = vld [vmem:[#allocation7 + $0x38] sm:$0xff]  ;;  %v1120_v4 = vld [vmem:[#allocation7 + $0x30] sm:$0xff]  ;;  %v1119_v5 = vld [vmem:[#allocation7 + $0x28] sm:$0xff] }
  0x26   :  { %547 = vmatpush.bf16.msra.mxu2 %v1084_v18  ;;  %v1118_v6 = vld [vmem:[#allocation7 + $0x20] sm:$0xff]  ;;  %v1117_v7 = vld [vmem:[#allocation7 + $0x18] sm:$0xff]  ;;  %v1116_v8 = vld [vmem:[#allocation7 + $0x10] sm:$0xff] }
  0x27   :  { %560 = vmatpush.bf16.msra.mxu3 %v1092_v19  ;;  %v210_v1 = vpack.c.b16 %v203_v61, %v203_v61  ;;  %v211_v2 = vpack.c.b16 %v204_v62, %v204_v62  ;;  %v1115_v9 = vld [vmem:[#allocation7 + $0x8] sm:$0xff]  ;;  %v1114_v12 = vld [vmem:[#allocation7] sm:$0xff]  ;;  %v1129_v15 = vld [vmem:[#allocation8 + $0x38] sm:$0xff] }
  0x28   :  { %522 = vmatpush.bf16.msra.mxu0 %v1067_v20  ;;  %v1128_v18 = vld [vmem:[#allocation8 + $0x30] sm:$0xff]  ;;  %v1137_v19 = vld [vmem:[%s1345_s2] ss:$0 sm:$0xff]  ;;  %v1127_v20 = vld [vmem:[#allocation8 + $0x28] sm:$0xff] }
  0x29   :  { %535 = vmatpush.bf16.msra.mxu1 %v1075_v21  ;;  %v1125_v26 = vld [vmem:[#allocation8 + $0x18] sm:$0xff]  ;;  %v1124_v29 = vld [vmem:[#allocation8 + $0x10] sm:$0xff] }
  0x2a   :  { %548 = vmatpush.bf16.msra.mxu2 %v1083_v22 }
  0x2b   :  { %561 = vmatpush.bf16.msra.mxu3 %v1091_v23 }
  0x2c   :  { %523 = vmatpush.bf16.msra.mxu0 %v1066_v24  ;;  %v1126_v24 = vld [vmem:[#allocation8 + $0x20] sm:$0xff] }
  0x2d   :  { %536 = vmatpush.bf16.msra.mxu1 %v1074_v25 }
  0x2e   :  { %549 = vmatpush.bf16.msra.mxu2 %v1082_v27 }
  0x2f   :  { %562 = vmatpush.bf16.msra.mxu3 %v1090_v30 }
  0x30   :  { %524 = vmatpush.bf16.msra.mxu0 %v1065_v32 }
  0x31   :  { %537 = vmatpush.bf16.msra.mxu1 %v1073_v33 }
  0x32   :  { %550 = vmatpush.bf16.msra.mxu2 %v1081_v36 }
  0x33   :  { %525 = vmatmul.bf16.vlgmr.msra.gmra.mxu0 %v206_v38  ;;  %563 = vmatpush.bf16.msra.mxu3 %v1089_v41  ;;  %v1123_v41 = vld [vmem:[#allocation8 + $0x8] sm:$0xff] }
  0x34   :  { %569 = vmatpush.bf16.msrb.mxu0 %v1104_v34  ;;  %538 = vmatmul.bf16.vlgmr.msra.gmra.mxu1 %v207_v39 }
  0x35   :  { %582 = vmatpush.bf16.msrb.mxu1 %v1112_v35  ;;  %551 = vmatmul.bf16.vlgmr.msra.gmra.mxu2 %v208_v45 }
  0x36   :  { %602 = vmatpush.bf16.msrb.mxu2 %v1113_v42  ;;  %564 = vmatmul.bf16.vlgmr.msra.gmra.mxu3 %v209_v46  ;;  %v1122_v42 = vld [vmem:[#allocation8] sm:$0xff] }
  0x37   :  { %678 = vmatpush.bf16.msrb.mxu3 %v1121_v3 }
  0x38   :  { %570 = vmatpush.bf16.msrb.mxu0 %v1103_v43  ;;  %v1138_v43 = vld [vmem:[%s1347_s4] ss:$0 sm:$0xff]  ;;  %s1278_s4 = smov [#allocation10]  }
  0x39   :  { %583 = vmatpush.bf16.msrb.mxu1 %v1111_v44  ;;  %s790_s24 = sshll.u32 %s1278_s4, 4  ;;  %s791_s24 = int_to_ptr.vmem [resolvable:$true] %s790_s24 }
  0x3a   :  { %761 = vmatpush.bf16.msra.mxu2 %v1129_v15 }
  0x3b   :  { %679 = vmatpush.bf16.msrb.mxu3 %v1120_v4 }
  0x3c   :  { %571 = vmatpush.bf16.msrb.mxu0 %v1102_v47 }
  0x3d   :  { %584 = vmatpush.bf16.msrb.mxu1 %v1110_v48 }
  0x3e   :  { %762 = vmatpush.bf16.msra.mxu2 %v1128_v18 }
  0x3f   :  { %680 = vmatpush.bf16.msrb.mxu3 %v1119_v5 }
  0x40   :  { %572 = vmatpush.bf16.msrb.mxu0 %v1101_v49  ;;  %v1139_v49 = vld [vmem:[%s1349_s6] ss:$0 sm:$0xff] }
  0x41   :  { %585 = vmatpush.bf16.msrb.mxu1 %v1109_v50 }
  0x42   :  { %763 = vmatpush.bf16.msra.mxu2 %v1127_v20 }
  0x43   :  { %681 = vmatpush.bf16.msrb.mxu3 %v1118_v6 }
  0x44   :  { %573 = vmatpush.bf16.msrb.mxu0 %v1100_v52 }
  0x45   :  { %586 = vmatpush.bf16.msrb.mxu1 %v1108_v53  ;;  %1000 = vmatmul.msk.bf16.vlgmr.msrb.gmra.mxu2 %vm513_vm0, %v212_v57 }
  0x46   :  { %764 = vmatpush.bf16.msra.mxu2 %v1126_v24 }
  0x47   :  { %682 = vmatpush.bf16.msrb.mxu3 %v1117_v7 }
  0x48   :  { %574 = vmatpush.bf16.msrb.mxu0 %v1099_v55 }
  0x49   :  { %587 = vmatpush.bf16.msrb.mxu1 %v1107_v56 }
  0x4a   :  { %765 = vmatpush.bf16.msra.mxu2 %v1125_v26 }
  0x4b   :  { %683 = vmatpush.bf16.msrb.mxu3 %v1116_v8 }
  0x4c   :  { %575 = vmatpush.bf16.msrb.mxu0 %v1098_v58 }
  0x4d   :  { %588 = vmatpush.bf16.msrb.mxu1 %v1106_v59 }
  0x4e   :  { %766 = vmatpush.bf16.msra.mxu2 %v1124_v29 }
  0x4f   :  { %684 = vmatpush.bf16.msrb.mxu3 %v1115_v9 }
  0x50   :  { %576 = vmatpush.bf16.msrb.mxu0 %v1097_v63 }
  0x51   :  { %589 = vmatpush.bf16.msrb.mxu1 %v1105_v0 }
  0x52   :  { %767 = vmatpush.bf16.msra.mxu2 %v1123_v41 }
  0x53   :  { %577 = vmatmul.bf16.vlgmr.msrb.gmra.mxu0 %v210_v1  ;;  %685 = vmatpush.bf16.msrb.mxu3 %v1114_v12 }
  0x54   :  { %590 = vmatmul.bf16.vlgmr.msrb.gmra.mxu1 %v211_v2 }
  0x56   :  { %768 = vmatpush.bf16.msra.mxu2 %v1122_v42 }
  0xb0   :  { %v526_v10 = vpop.f32.mrf.mxu0 }
  0xb1   :  { %v539_v11 = vpop.f32.mrf.mxu1  ;;  %v527_v21 = vadd.f32 %v1137_v19, %v526_v10 }
  0xb3   :  { %v540_v25 = vadd.f32 %v539_v11, %v527_v21 }
  0xb8   :  { %v528_v13 = vpop.f32.mrf.mxu0  ;;  %v552_v16 = vpop.f32.mrf.mxu2 }
  0xb9   :  { %v541_v14 = vpop.f32.mrf.mxu1  ;;  %v565_v17 = vpop.f32.mrf.mxu3  ;;  %v553_v27 = vadd.f32 %v552_v16, %v540_v25 }
  0xbb   :  { %v566_v30 = vadd.f32 %v565_v17, %v553_v27 }
  0xc0   :  { %v554_v22 = vpop.f32.mrf.mxu2 }
  0xc1   :  { %v567_v23 = vpop.f32.mrf.mxu3 }
  0xc8   :  { %v604_v28 = vpop.f32.mrf.mxu2 }
  0xd0   :  { %v578_v31 = vpop.f32.mrf.mxu0  ;;  %v606_v35 = vpop.f32.mrf.mxu2 }
  0xd1   :  { %v591_v32 = vpop.f32.mrf.mxu1  ;;  %v579_v33 = vadd.f32 %v578_v31, %v566_v30 }
  0xd3   :  { %v592_v34 = vadd.f32 %v591_v32, %v579_v33 }
  0xd5   :  { %v605_v36 = vadd.f32 %v604_v28, %v592_v34 }
  0xd7   :  { %v608_v37 = vmax.f32 %v605_v36, 0.0 }
  0xd8   :  { %v580_v38 = vpop.f32.mrf.mxu0 }
  0xd9   :  { %v593_v39 = vpop.f32.mrf.mxu1  ;;  %v609_v40 = vpack.c.bf16 %v608_v37, %v608_v37 }
  0xdb   :  { %686 = vmatmul.bf16.vlgmr.msrb.gmra.mxu3 %v609_v40 }
 0x15e   :  { %v687_v44 = vpop.f32.mrf.mxu3 }
 0x15f   :  { %v688_v45 = vadd.f32 %v1138_v43, %v687_v44 }
 0x161   :  { %v691_v46 = vmax.f32 %v688_v45, 0.0 }
 0x163   :  { %v692_v47 = vpack.c.bf16 %v691_v46, %v691_v46 }
 0x165   :  { %769 = vmatmul.bf16.vlgmr.msra.gmra.mxu2 %v692_v47 }
 0x166   :  { %v689_v48 = vpop.f32.mrf.mxu3 }
 0x1e8   :  { %v770_v50 = vpop.f32.mrf.mxu2 }
 0x1e9   :  { %v771_v51 = vadd.f32 %v1139_v49, %v770_v50 }
 0x1eb   :  { %774 = vmax.xlane.f32.xlu0 %v771_v51 }
 0x1f0   :  { %v772_v52 = vpop.f32.mrf.mxu2 }
 0x25e   :  { %v775_v53 = vpop.xlane.xlu0 %774 }
 0x25f   :  { %v776_v54 = vsub.f32 %v771_v51, %v775_v53 }
 0x261   :  { %v777_v55 = vmul.f32 1.442695, %v776_v54 }
 0x263   :  { %1140 = vpow2.f32 %v777_v55 }
 0x269   :  { %v1141_v56 = vpop.eup %1140 }
 0x26a   :  { %779 = vadd.xlane.f32.xlu0 %v1141_v56 }
 0x2dd   :  { %v780_v57 = vpop.xlane.xlu0 %779 }
 0x2de   :  { %1142 = vlog2.f32 %v780_v57 }
 0x2e4   :  { %v1143_v58 = vpop.eup %1142 }
 0x2e5   :  { %v782_v59 = vmul.f32 0.6931472, %v1143_v58 }
 0x2e7   :  { %v783_v60 = vsub.f32 %v776_v54, %v782_v59 }
 0x2e9   :  { %784 = vst [vmem:[#allocation10] sm:$0xff] %v783_v60 }
 0x2ea   :  { %795 = dma.vmem_to_hbm [thread:$0]  %s791_s24, 128, %s793_s27, [#allocation4]  }
 0x2eb   :  { %1270 = dma.done.wait [#allocation4], 128  }
 0x2ec   :  { %1271 = vsyncadd [#allocation4], 4294967168 }
 0x2ed   :  { %800 = vsyncpa [#allocation3], 1 }
 0x2ee   :  { %801 = vsyncpa [#allocation6], 1 }
 0x2ef   :  { %802 = vsyncpa [#allocation9], 1 }
 0x2f0   :  { %803 = vsyncpa [#allocation4], 1 }

</bundles_post_ra>
